<compile_context>
chip_gen: v5e
topology: v5e:2x2
jax: 0.10.0
libtpu: 0.0.40
codegen_flags: <defaults>
</compile_context>

<pallas_src>
import math

import jax
import jax.numpy as jnp
from jax import lax
from jax.experimental import pallas as pl
from jax.experimental.pallas import tpu as pltpu


def _round_up(x, m):
    return (x + m - 1) // m * m


def _arc_subcenter_kernel(x_ref, inv_ref, w_ref, o_ref):
    """One (TB, TOF) output tile; the k subcenter axis is folded into the block.

    x_ref  : (TB, IN)        compute-dtype features (un-normalized)
    inv_ref: (TB, 1)   f32   per-row inverse L2 norms (precomputed in wrapper)
    w_ref  : (k, IN, TOF)    pre-normalized, pre-transposed weight tile
    o_ref  : (TB, TOF) f32   cosine output tile
    """
    x = x_ref[...]
    k = w_ref.shape[0]
    # Unrolled running max over the k subcenters: k MXU matmuls, k-1 VPU maxes.
    m = jnp.dot(x, w_ref[0], preferred_element_type=jnp.float32)
    for i in range(1, k):
        m = jnp.maximum(m, jnp.dot(x, w_ref[i], preferred_element_type=jnp.float32))
    # Rank-1 post-matmul scale (weight rows are already unit-norm).
    o_ref[...] = m * inv_ref[...]


def prepare_arcface_weight(weight, *, out_features, k, compute_dtype=jnp.bfloat16):
    """One-time parameter prep (call at load time, NOT per forward call).

    weight: (out_features * k, in_features) f32, PyTorch class-major row layout.
    Returns (k, in_features, OF_pad) in `compute_dtype`, rows L2-normalized,
    class dim zero-padded lane-dense, pre-transposed for the kernel's RHS.
    """
    of_k, in_features = weight.shape
    assert of_k == out_features * k
    # class-major rows (c*k + i) -> subcenter-major (i, c, :)
    w = weight.reshape(out_features, k, in_features).transpose(1, 0, 2)  # (k, OF, IN)
    # L2-normalize rows in f32 (matches F.normalize eps=1e-12); batch-independent.
    w = w / jnp.maximum(jnp.linalg.norm(w, axis=-1, keepdims=True), 1e-12)
    # Pad class dim to 512-wide tiles when large (128-aligned when small).
    # Padded rows are all-zero -> cosine exactly 0 -> sliced off by the wrapper.
    of_pad = _round_up(out_features, 512 if out_features > 512 else 128)
    if of_pad != out_features:
        w = jnp.pad(w, ((0, 0), (0, of_pad - out_features), (0, 0)))
    # Pre-transpose to (k, IN, OF_pad): kernel RHS is (IN, TOF), natural MXU
    # layout, no per-tile XLU transpose/relayout.
    w = jnp.transpose(w, (0, 2, 1))
    return w.astype(compute_dtype)


def arc_margin_product_subcenter(features, w_prepped, *, out_features,
                                 feature_vmem_budget_bytes=2 * 1024 * 1024):
    """features: (B, IN) f32; w_prepped: output of prepare_arcface_weight."""
    B, in_features = features.shape
    k, in_w, of_pad = w_prepped.shape
    assert in_w == in_features
    compute_dtype = w_prepped.dtype
    itemsize = jnp.dtype(compute_dtype).itemsize

    # Hoisted out of the kernel: per-row inverse L2 norm in f32
    # (rsqrt(max(||x||^2, 1e-24)) == 1 / max(||x||, 1e-12), torch F.normalize),
    # plus the cast to compute dtype (halves feature HBM traffic on bf16 path).
    xf = features.astype(jnp.float32)
    inv_xn = lax.rsqrt(jnp.maximum(jnp.sum(xf * xf, axis=-1, keepdims=True), 1e-24))
    x = features.astype(compute_dtype)

    # Class-tile width: lane-dense, capped so the double-buffered weight tile
    # (2 * k * IN * TOF * itemsize) stays a few MiB.
    tof = of_pad if of_pad <= 512 else 512
    while (tof > 128 and of_pad % (tof // 2) == 0
           and 2 * k * in_features * tof * itemsize > 12 * 1024 * 1024):
        tof //= 2

    b_small = _round_up(B, 8)
    use_resident = (b_small * in_features * itemsize <= feature_vmem_budget_bytes
                    and b_small <= 1024)

    if use_resident:
        # Mode A: whole feature matrix VMEM-resident; grid only over OF tiles.
        tb = b_pad = b_small
        grid = (of_pad // tof,)
        in_specs = [
            pl.BlockSpec((tb, in_features), lambda j: (0, 0)),
            pl.BlockSpec((tb, 1), lambda j: (0, 0)),
            pl.BlockSpec((k, in_features, tof), lambda j: (0, 0, j)),
        ]
        out_specs = pl.BlockSpec((tb, tof), lambda j: (0, j))
        dim_sem = ("parallel",)
    else:
        # Mode B: (OF tiles, batch tiles) with batch INNERMOST so the weight
        # tile's block index is constant across the inner loop -> DMA'd once per
        # OF tile, reused for all batch tiles.
        # TODO(synk): on v5e (4x128 MXU) TB=128 is enough; 256 targets v6e/v7x.
        tb = min(256, b_small)
        b_pad = _round_up(B, tb)
        grid = (of_pad // tof, b_pad // tb)
        in_specs = [
            pl.BlockSpec((tb, in_features), lambda j, b: (b, 0)),
            pl.BlockSpec((tb, 1), lambda j, b: (b, 0)),
            pl.BlockSpec((k, in_features, tof), lambda j, b: (0, 0, j)),
        ]
        out_specs = pl.BlockSpec((tb, tof), lambda j, b: (b, j))
        # OF leading + "parallel": megacore split lands on classes, not batch
        # (each core then streams only its half of the weight).
        dim_sem = ("parallel", "arbitrary")

    if b_pad != B:
        x = jnp.pad(x, ((0, b_pad - B), (0, 0)))
        inv_xn = jnp.pad(inv_xn, ((0, b_pad - B), (0, 0)))

    out = pl.pallas_call(
        _arc_subcenter_kernel,
        out_shape=jax.ShapeDtypeStruct((b_pad, of_pad), jnp.float32),
        grid=grid,
        in_specs=in_specs,
        out_specs=out_specs,
        compiler_params=pltpu.CompilerParams(dimension_semantics=dim_sem),
    )(x, inv_xn, w_prepped)

    # TODO(synk): for very large out_features, fuse this slice into the consumer
    # (it re-reads/re-writes the whole logits slab in HBM); padded classes are 0.
    return out[:B, :out_features]


def _reference(features, weight, out_features, k):
    # Pure-JAX f32 reference mirroring the PyTorch module exactly.
    fn = features / jnp.maximum(
        jnp.linalg.norm(features, axis=-1, keepdims=True), 1e-12)
    wn = weight / jnp.maximum(
        jnp.linalg.norm(weight, axis=-1, keepdims=True), 1e-12)
    cosine_all = (fn @ wn.T).reshape(-1, out_features, k)
    return jnp.max(cosine_all, axis=2)


if __name__ == "__main__":
    in_features = 32
    out_features = 16
    k = 3
    batch = 8

    key = jax.random.PRNGKey(0)
    kw, kx = jax.random.split(key)

    # Deterministic parameter init matching reset_parameters():
    stdv = 1.0 / math.sqrt(in_features)
    weight = jax.random.uniform(
        kw, (out_features * k, in_features),
        minval=-stdv, maxval=stdv, dtype=jnp.float32)
    features = jax.random.normal(kx, (batch, in_features), dtype=jnp.float32)

    ref = _reference(features, weight, out_features, k)

    # bf16-weight fast path (Mode A, feature-resident): f32 accumulation,
    # loose tolerance vs the f32 reference.
    w_bf16 = prepare_arcface_weight(weight, out_features=out_features, k=k,
                                    compute_dtype=jnp.bfloat16)
    out = jax.block_until_ready(
        arc_margin_product_subcenter(features, w_bf16, out_features=out_features))
    assert out.shape == (batch, out_features)
    assert jnp.allclose(out, ref, atol=2e-2, rtol=2e-2), "bf16 path mismatch vs reference"

    # f32-operand validation path (Mode A): must match the reference tightly.
    w_f32 = prepare_arcface_weight(weight, out_features=out_features, k=k,
                                   compute_dtype=jnp.float32)
    out_f32 = jax.block_until_ready(
        arc_margin_product_subcenter(features, w_f32, out_features=out_features))
    assert jnp.allclose(out_f32, ref, atol=1e-5, rtol=1e-5), "f32 path mismatch vs reference"

    # Force the tiled Mode B grid (weight reused across batch tiles) and check it too.
    out_tiled = jax.block_until_ready(
        arc_margin_product_subcenter(features, w_f32, out_features=out_features,
                                     feature_vmem_budget_bytes=0))
    assert jnp.allclose(out_tiled, ref, atol=1e-5, rtol=1e-5), "tiled path mismatch vs reference"

    print("KERNEL_OK")
</pallas_src>

<mosaic_0001>
module attributes {stable_mosaic.version = 11 : i64} {
  func.func @_arc_subcenter_kernel(%arg0: i32, %arg1: memref<8x32xbf16, #tpu.memory_space<vmem>>, %arg2: memref<8x1xf32, #tpu.memory_space<vmem>>, %arg3: memref<3x32x128xbf16, #tpu.memory_space<vmem>>, %arg4: memref<8x128xf32, #tpu.memory_space<vmem>>) attributes {dimension_semantics = [#tpu.dimension_semantics<parallel>], iteration_bounds = array<i64: 1>, scalar_prefetch = 0 : i64, scratch_operands = 0 : i64, tpu.core_type = #tpu.core_type<tc>, window_params = [{pipeline_mode = #tpu.pipeline_mode<synchronous>, transform_indices = @transform_0, window_bounds = array<i64: 8, 32>}, {pipeline_mode = #tpu.pipeline_mode<synchronous>, transform_indices = @transform_1, window_bounds = array<i64: 8, 1>}, {transform_indices = @transform_2, window_bounds = array<i64: 3, 32, 128>}, {transform_indices = @transform_3, window_bounds = array<i64: 8, 128>}]} {
    %c0 = arith.constant 0 : index
    %c0_0 = arith.constant 0 : index
    %0 = vector.load %arg1[%c0, %c0_0] : memref<8x32xbf16, #tpu.memory_space<vmem>>, vector<8x32xbf16>
    %c0_1 = arith.constant 0 : index
    %c0_2 = arith.constant 0 : index
    %c0_3 = arith.constant 0 : index
    %1 = vector.load %arg3[%c0_1, %c0_2, %c0_3] : memref<3x32x128xbf16, #tpu.memory_space<vmem>>, vector<1x32x128xbf16>
    %2 = vector.shape_cast %1 : vector<1x32x128xbf16> to vector<32x128xbf16>
    %cst = arith.constant dense<0.000000e+00> : vector<8x128xf32>
    %3 = tpu.matmul %0, %2, %cst {dimension_numbers = #tpu.dot_dimension_numbers<[1], [0], [0], [1], [0, 0, 1, 1], [], []>} : vector<8x32xbf16>, vector<32x128xbf16>, vector<8x128xf32> -> vector<8x128xf32>
    %c1 = arith.constant 1 : index
    %c0_4 = arith.constant 0 : index
    %c0_5 = arith.constant 0 : index
    %4 = vector.load %arg3[%c1, %c0_4, %c0_5] : memref<3x32x128xbf16, #tpu.memory_space<vmem>>, vector<1x32x128xbf16>
    %5 = vector.shape_cast %4 : vector<1x32x128xbf16> to vector<32x128xbf16>
    %cst_6 = arith.constant dense<0.000000e+00> : vector<8x128xf32>
    %6 = tpu.matmul %0, %5, %cst_6 {dimension_numbers = #tpu.dot_dimension_numbers<[1], [0], [0], [1], [0, 0, 1, 1], [], []>} : vector<8x32xbf16>, vector<32x128xbf16>, vector<8x128xf32> -> vector<8x128xf32>
    %7 = arith.maximumf %3, %6 : vector<8x128xf32>
    %c2 = arith.constant 2 : index
    %c0_7 = arith.constant 0 : index
    %c0_8 = arith.constant 0 : index
    %8 = vector.load %arg3[%c2, %c0_7, %c0_8] : memref<3x32x128xbf16, #tpu.memory_space<vmem>>, vector<1x32x128xbf16>
    %9 = vector.shape_cast %8 : vector<1x32x128xbf16> to vector<32x128xbf16>
    %cst_9 = arith.constant dense<0.000000e+00> : vector<8x128xf32>
    %10 = tpu.matmul %0, %9, %cst_9 {dimension_numbers = #tpu.dot_dimension_numbers<[1], [0], [0], [1], [0, 0, 1, 1], [], []>} : vector<8x32xbf16>, vector<32x128xbf16>, vector<8x128xf32> -> vector<8x128xf32>
    %11 = arith.maximumf %7, %10 : vector<8x128xf32>
    %c0_10 = arith.constant 0 : index
    %c0_11 = arith.constant 0 : index
    %12 = vector.load %arg2[%c0_10, %c0_11] : memref<8x1xf32, #tpu.memory_space<vmem>>, vector<8x1xf32>
    %13 = vector.broadcast %12 : vector<8x1xf32> to vector<8x128xf32>
    %14 = arith.mulf %11, %13 : vector<8x128xf32>
    %c0_12 = arith.constant 0 : index
    %c0_13 = arith.constant 0 : index
    %15 = vector.load %arg4[%c0_12, %c0_13] : memref<8x128xf32, #tpu.memory_space<vmem>>, vector<8x128xf32>
    tpu.vector_store %arg4[%c0_12, %c0_13], %14 {strides = array<i32>} : memref<8x128xf32, #tpu.memory_space<vmem>>, vector<8x128xf32>,
    return
  }
  func.func @transform_0(%arg0: i32) -> (i32, i32) {
    %c0_i32 = arith.constant 0 : i32
    %c0_i32_0 = arith.constant 0 : i32
    %c0_i32_1 = arith.constant 0 : i32
    return %c0_i32, %c0_i32_0 : i32, i32
  }
  func.func @transform_1(%arg0: i32) -> (i32, i32) {
    %c0_i32 = arith.constant 0 : i32
    %c0_i32_0 = arith.constant 0 : i32
    %c0_i32_1 = arith.constant 0 : i32
    return %c0_i32, %c0_i32_0 : i32, i32
  }
  func.func @transform_2(%arg0: i32) -> (i32, i32, i32) {
    %c0_i32 = arith.constant 0 : i32
    %c0_i32_0 = arith.constant 0 : i32
    %c0_i32_1 = arith.constant 0 : i32
    return %c0_i32, %c0_i32_0, %arg0 : i32, i32, i32
  }
  func.func @transform_3(%arg0: i32) -> (i32, i32) {
    %c0_i32 = arith.constant 0 : i32
    %c0_i32_0 = arith.constant 0 : i32
    return %c0_i32, %arg0 : i32, i32
  }
}

</mosaic_0001>

<bundles_post_ra>
// kernel: tpu_custom_call.1
= control target key start
LH: loop header
LB: loop body
LE: loop exit
PB: predicated region body
PF: predicated region fallthrough
CT: control target
= control target key end

     0   :  { %8 = vsyncpa [#allocation3], 0  ;;  %s281_s0 = inlined_call_operand.vmem [shape: bf16[8,32], index: 0, kind: input, shape index: {}]   ;;  %s282_s1 = inlined_call_operand.vmem [shape: f32[8,1], index: 1, kind: input, shape index: {}]   ;;  %s283_s2 = inlined_call_operand.hbm [shape: bf16[3,32,128], index: 2, kind: input, shape index: {}]   ;;  %s284_s3 = inlined_call_operand.hbm [shape: f32[8,128], index: 3, kind: output, shape index: {}]  }
   0x1   :  { %9 = vsyncpa [#allocation4], 0  ;;  %s18_s14 = sshll.u32 %s283_s2, 4  ;;  %s244_s15 = smov [#allocation2]   ;;  %s19_s14 = int_to_ptr.hbm [resolvable:$true] %s18_s14 }
   0x2   :  { %s20_s16 = sshll.u32 %s244_s15, 4  ;;  %s245_s17 = smov 64   ;;  %s21_s16 = int_to_ptr.vmem [resolvable:$true] %s20_s16 }
   0x3   :  { %s246_s18 = smov 4  }
   0x4   :  { %26 = dma.hbm_to_vmem [thread:$0]  %s19_s14, 768, %s21_s16, [#allocation3], %s245_s17, %s245_s17, %s246_s18  }
   0x5   :  { %240 = dma.done.wait [#allocation3], 768  }
   0x6   :  { %241 = vsyncadd [#allocation3], 4294966528  ;;  %v247_v0 = vmov 0   ;;  %v181_v1 = vld [vmem:[#allocation2 + $0x8] sm:$0xff]  ;;  %v183_v2 = vld [vmem:[#allocation2 + $0x18] sm:$0xff]  ;;  %vm49_vm0 = vcmask 261120  }
   0x7   :  { %191 = vset.pattern.permute.xlu0 %v247_v0  ;;  %v185_v3 = vld [vmem:[#allocation2 + $0x28] sm:$0xff]  ;;  %59 = vmatpush.bf16.msra.mxu0 %v181_v1  ;;  %v180_v4 = vld [vmem:[#allocation2] sm:$0xff]  ;;  %v182_v5 = vld [vmem:[#allocation2 + $0x10] sm:$0xff]  ;;  %s143_s25 = sshll.u32 %s284_s3, 4  ;;  %s144_s25 = int_to_ptr.hbm [resolvable:$true] %s143_s25 }
   0x8   :  { %89 = vmatpush.bf16.msra.mxu1 %v183_v2  ;;  %v128_v6 = vld [vmem:[%s282_s1] sm:$0xff]  ;;  %120 = vmatpush.bf16.msra.mxu2 %v185_v3  ;;  %s248_s1 = smov [#allocation5]  }
   0x9   :  { %v184_v7 = vld [vmem:[#allocation2 + $0x20] sm:$0xff]  ;;  %131 = vperm.xlu0 %191, %v128_v6   ;;  %s141_s22 = sshll.u32 %s248_s1, 4  ;;  %s142_s22 = int_to_ptr.vmem [resolvable:$true] %s141_s22 }
   0xa   :  { %v32_v8 = vld [vmem:[%s281_s0] sm:$0xf] }
   0xb   :  { %60 = vmatpush.bf16.msra.mxu0 %v180_v4 }
   0xc   :  { %90 = vmatpush.bf16.msra.mxu1 %v182_v5  ;;  %121 = vmatpush.bf16.msra.mxu2 %v184_v7 }
   0xe   :  { %161 = vmatmul.msk.bf16.vlgmr.msra.gmra.mxu0 %vm49_vm0, %v32_v8 }
   0xf   :  { %170 = vmatmul.msk.bf16.vlgmr.msra.gmra.mxu1 %vm49_vm0, %v32_v8  ;;  %179 = vmatmul.msk.bf16.vlgmr.msra.gmra.mxu2 %vm49_vm0, %v32_v8 }
  0x7b   :  { %v132_v13 = vpop.permute.xlu0 %131 }
  0x8b   :  { %v62_v9 = vpop.f32.mrf.mxu0 }
  0x8c   :  { %v92_v10 = vpop.f32.mrf.mxu1 }
  0x8d   :  { %v96_v11 = vmax.f32 %v62_v9, %v92_v10 }
  0x92   :  { %v123_v12 = vpop.f32.mrf.mxu2 }
  0x93   :  { %v127_v14 = vmax.f32 %v96_v11, %v123_v12  ;;  %v64_v15 = vpop.f32.mrf.mxu0 }
  0x94   :  { %v94_v16 = vpop.f32.mrf.mxu1 }
  0x95   :  { %v134_v17 = vmul.f32 %v132_v13, %v127_v14 }
  0x97   :  { %135 = vst [vmem:[#allocation5] sm:$0xff] %v134_v17 }
  0x98   :  { %146 = dma.vmem_to_hbm [thread:$0]  %s142_s22, 128, %s144_s25, [#allocation4]  }
  0x9a   :  { %v125_v18 = vpop.f32.mrf.mxu2 }
  0x9b   :  { %242 = dma.done.wait [#allocation4], 128  }
  0x9c   :  { %243 = vsyncadd [#allocation4], 4294967168 }
  0x9d   :  { %151 = vsyncpa [#allocation3], 1 }
  0x9e   :  { %152 = vsyncpa [#allocation4], 1 }

</bundles_post_ra>
